<compile_context>
chip_gen: v6e
topology: v6e:2x2x1
jax: 0.10.0
libtpu: 0.0.40
codegen_flags: <defaults>
</compile_context>

<pallas_src>
import functools

import jax
import jax.numpy as jnp
from jax import lax
from jax.experimental import pallas as pl
from jax.experimental.pallas import tpu as pltpu


def _focal_loss_kernel(x_ref, t_ref, loss_ref, *, gamma, ignore_index,
                       block_n, n_rows):
    i = pl.program_id(0)

    x = x_ref[...].astype(jnp.float32)            # (TN, C), cast in-kernel
    t = t_ref[...]                                # (TN, 1) int32

    # Numerically stable log-softmax pieces along the class (lane) axis.
    m = jnp.max(x, axis=1, keepdims=True)
    shifted = x - m
    lse = jnp.log(jnp.sum(jnp.exp(shifted), axis=1, keepdims=True))   # (TN,1)
    # TODO(synk): for small C (<~256) the two lane-axis sums could be moved to
    # the idle MXU via jnp.dot(..., ones((C,1))); needs a bundle dump to verify.

    # Gather shifted[row, target[row]] via a one-hot lane mask, then do the
    # focal math on the (TN, 1) target column only (one full-tile exp total,
    # no full-tile pow/mul).
    col = lax.broadcasted_iota(jnp.int32, x.shape, 1)
    onehot = col == t                                                  # (TN,C)
    shifted_t = jnp.sum(jnp.where(onehot, shifted, 0.0), axis=1, keepdims=True)
    log_pt_t = shifted_t - lse                                         # (TN,1)
    pt_t = jnp.exp(log_pt_t)
    one_minus = 1.0 - pt_t

    if gamma == 2:                          # default path: two cheap VPU muls
        mod = one_minus * one_minus
    elif float(gamma) == int(gamma):        # any integer gamma stays off EUP
        mod = lax.integer_pow(one_minus, int(gamma))
    else:
        mod = one_minus ** gamma            # TODO(synk): float gamma uses EUP pow
    focal_t = mod * log_pt_t                                           # (TN,1)

    # Row validity: real (non-tail) row AND target != ignore_index.
    # jnp.where is a select (not multiply) so NaN/Inf from garbage tail rows
    # never contaminate the sum.
    row = i * block_n + lax.broadcasted_iota(jnp.int32, t.shape, 0)
    valid = jnp.logical_and(t != ignore_index, row < n_rows)

    # In-kernel reduction to a single scalar partial per grid step; store it
    # at [0, 0] of a lane-dense (8,128) tile of zeros (unmasked full-vreg
    # stores, negligible HBM write traffic).
    partial = jnp.sum(jnp.where(valid, -focal_t, 0.0))
    rr = lax.broadcasted_iota(jnp.int32, (8, 128), 0)
    cc = lax.broadcasted_iota(jnp.int32, (8, 128), 1)
    loss_ref[...] = jnp.where(jnp.logical_and(rr == 0, cc == 0), partial, 0.0)


def _vmem_config():
    """(vmem_limit_bytes, block-selection budget) sized per TPU generation."""
    try:
        cap = int(pltpu.get_tpu_info().vmem_capacity_bytes)
    except Exception:  # be conservative if the query is unavailable
        cap = 64 << 20
    if cap <= (64 << 20):        # v7x-class: 64 MiB physical VMEM per TC
        limit = 40 << 20
    else:                        # v5e/v6e: 128 MiB physical VMEM
        limit = 80 << 20
    return limit, int(limit * 0.7)


def _pick_block_n(n, c, in_itemsize, *, vmem_budget, traffic_target=4 << 20):
    """Row-tile size: multiple of 8, ~4 MiB HBM traffic/step, VMEM-safe,
    and small enough that grid_n >= 2 (both v7x TensorCores usable)."""
    if n < 8:
        return int(n)                       # block dim == full array dim: legal
    # Per-row VMEM working set:
    #   double-buffered input tile          : 2 * C * itemsize
    #   ~4 live f32 (row, C) temporaries    : 4 * C * 4
    #   double-buffered lane-padded target  : 2 * 128 * 4
    per_row = 2 * c * in_itemsize + 4 * c * 4 + 2 * 128 * 4
    rows_by_vmem = max(8, (vmem_budget // per_row) // 8 * 8)
    rows_by_traffic = max(8, (traffic_target // (c * in_itemsize)) // 8 * 8)
    half = max(8, ((n + 1) // 2 + 7) // 8 * 8)   # keep >= 2 grid steps
    return int(min(rows_by_vmem, rows_by_traffic, half))


def focal_loss(x, target, *, gamma=2, ignore_index=-100, block_n=None):
    """x: [N, C] float (any float dtype), target: [N] int. Scalar mean loss.

    Matches torch FocalLoss(gamma=2, weight=None, reduction='mean',
    ignore_index=-100).forward(x, target).
    NOTE: if every target equals ignore_index the result is NaN (0/0),
    matching torch nll_loss 'mean' behavior.
    """
    # TODO(synk): class `weight` tensor and reduction='none'/'sum' variants are
    # not wired up (module defaults are weight=None, reduction='mean').
    n, c = x.shape
    target = target.astype(jnp.int32)
    target2d = target.reshape(n, 1)

    vmem_limit, vmem_budget = _vmem_config()
    if block_n is None:
        block_n = _pick_block_n(n, c, jnp.dtype(x.dtype).itemsize,
                                vmem_budget=vmem_budget)

    grid_n = int(pl.cdiv(n, block_n))       # ragged tail masked in-kernel

    kernel = functools.partial(_focal_loss_kernel, gamma=gamma,
                               ignore_index=ignore_index,
                               block_n=block_n, n_rows=n)

    parts = pl.pallas_call(
        kernel,
        out_shape=jax.ShapeDtypeStruct((grid_n * 8, 128), jnp.float32),
        grid_spec=pltpu.PrefetchScalarGridSpec(
            num_scalar_prefetch=0,
            grid=(grid_n,),
            in_specs=[
                pl.BlockSpec((block_n, c), lambda i: (i, 0)),
                pl.BlockSpec((block_n, 1), lambda i: (i, 0)),
            ],
            out_specs=pl.BlockSpec((8, 128), lambda i: (i, 0)),
        ),
        compiler_params=pltpu.CompilerParams(
            dimension_semantics=("parallel",),      # both TCs on v7x
            vmem_limit_bytes=vmem_limit),
    )(x, target2d)

    # Tiny final reductions in plain JAX. Only parts[i*8, 0] are nonzero, so a
    # plain sum over the (grid_n*8, 128) slab is correct. Valid-row count is
    # an exact int32 computed directly from `target`.
    total = jnp.sum(parts)
    valid_cnt = jnp.sum((target != ignore_index).astype(jnp.int32))
    return total / valid_cnt.astype(jnp.float32)


def _focal_loss_ref(x, target, *, gamma=2, ignore_index=-100):
    log_pt = jax.nn.log_softmax(x.astype(jnp.float32), axis=1)
    pt = jnp.exp(log_pt)
    fl = ((1.0 - pt) ** gamma) * log_pt
    valid = target != ignore_index
    safe_t = jnp.where(valid, target, 0)
    picked = fl[jnp.arange(x.shape[0]), safe_t]
    vf = valid.astype(jnp.float32)
    return jnp.sum(-picked * vf) / jnp.sum(vf)


if __name__ == "__main__":
    # Case 1: f32 logits, N multiple of 8, one ignored row (grid_n == 2).
    key = jax.random.PRNGKey(0)
    kx, kt = jax.random.split(key)
    N, C = 16, 32
    x = jax.random.normal(kx, (N, C), dtype=jnp.float32)
    target = jax.random.randint(kt, (N,), 0, C, dtype=jnp.int32)
    target = target.at[3].set(-100)

    loss = jax.block_until_ready(focal_loss(x, target))
    ref = _focal_loss_ref(x, target)
    assert jnp.allclose(loss, ref, atol=1e-5, rtol=1e-5), (loss, ref)

    # Case 2: bf16 logits, ragged N (exercises in-kernel tail masking, no pad).
    kx2, kt2 = jax.random.split(jax.random.PRNGKey(1))
    N2, C2 = 13, 128
    x2 = jax.random.normal(kx2, (N2, C2), dtype=jnp.bfloat16)
    target2 = jax.random.randint(kt2, (N2,), 0, C2, dtype=jnp.int32)
    target2 = target2.at[0].set(-100)

    loss2 = jax.block_until_ready(focal_loss(x2, target2))
    ref2 = _focal_loss_ref(x2, target2)
    assert jnp.allclose(loss2, ref2, atol=1e-4, rtol=1e-4), (loss2, ref2)

    print("KERNEL_OK")
</pallas_src>

<mosaic_0001>
module attributes {stable_mosaic.version = 11 : i64} {
  func.func @_focal_loss_kernel(%arg0: i32, %arg1: memref<8x32xf32, #tpu.memory_space<vmem>>, %arg2: memref<8x1xi32, #tpu.memory_space<vmem>>, %arg3: memref<8x128xf32, #tpu.memory_space<vmem>>) attributes {dimension_semantics = [#tpu.dimension_semantics<parallel>], iteration_bounds = array<i64: 2>, scalar_prefetch = 0 : i64, scratch_operands = 0 : i64, tpu.core_type = #tpu.core_type<tc>, window_params = [{transform_indices = @transform_0, window_bounds = array<i64: 8, 32>}, {transform_indices = @transform_1, window_bounds = array<i64: 8, 1>}, {transform_indices = @transform_2, window_bounds = array<i64: 8, 128>}]} {
    %c0 = arith.constant 0 : index
    %c0_0 = arith.constant 0 : index
    %0 = vector.load %arg1[%c0, %c0_0] : memref<8x32xf32, #tpu.memory_space<vmem>>, vector<8x32xf32>
    %c0_1 = arith.constant 0 : index
    %c0_2 = arith.constant 0 : index
    %1 = vector.load %arg2[%c0_1, %c0_2] : memref<8x1xi32, #tpu.memory_space<vmem>>, vector<8x1xi32>
    %cst = arith.constant dense<0xFF800000> : vector<8xf32>
    %2 = vector.multi_reduction <maximumf>, %0, %cst [1] : vector<8x32xf32> to vector<8xf32>
    %3 = vector.shape_cast %2 : vector<8xf32> to vector<8x1xf32>
    %4 = vector.broadcast %3 : vector<8x1xf32> to vector<8x32xf32>
    %5 = arith.subf %0, %4 : vector<8x32xf32>
    %6 = math.exp %5 : vector<8x32xf32>
    %cst_3 = arith.constant dense<0.000000e+00> : vector<8xf32>
    %7 = vector.multi_reduction <add>, %6, %cst_3 [1] : vector<8x32xf32> to vector<8xf32>
    %8 = vector.shape_cast %7 : vector<8xf32> to vector<8x1xf32>
    %9 = math.log %8 : vector<8x1xf32>
    %10 = tpu.iota {dimensions = array<i32: 1>} : vector<8x32xi32>
    %11 = vector.broadcast %1 : vector<8x1xi32> to vector<8x32xi32>
    %12 = arith.cmpi eq, %10, %11 : vector<8x32xi32>
    %cst_4 = arith.constant 0.000000e+00 : f32
    %13 = vector.broadcast %cst_4 : f32 to vector<8x32xf32>
    %14 = arith.select %12, %5, %13 : vector<8x32xi1>, vector<8x32xf32>
    %cst_5 = arith.constant dense<0.000000e+00> : vector<8xf32>
    %15 = vector.multi_reduction <add>, %14, %cst_5 [1] : vector<8x32xf32> to vector<8xf32>
    %16 = vector.shape_cast %15 : vector<8xf32> to vector<8x1xf32>
    %17 = arith.subf %16, %9 : vector<8x1xf32>
    %18 = math.exp %17 : vector<8x1xf32>
    %cst_6 = arith.constant 1.000000e+00 : f32
    %19 = vector.broadcast %cst_6 : f32 to vector<8x1xf32>
    %20 = arith.subf %19, %18 : vector<8x1xf32>
    %21 = arith.mulf %20, %20 : vector<8x1xf32>
    %22 = arith.mulf %21, %17 : vector<8x1xf32>
    %c8_i32 = arith.constant 8 : i32
    %23 = arith.muli %arg0, %c8_i32 : i32
    %24 = tpu.iota {dimensions = array<i32: 0>} : vector<8x1xi32>
    %25 = vector.broadcast %23 : i32 to vector<8x1xi32>
    %26 = arith.addi %25, %24 : vector<8x1xi32>
    %c-100_i32 = arith.constant -100 : i32
    %27 = vector.broadcast %c-100_i32 : i32 to vector<8x1xi32>
    %28 = arith.cmpi ne, %1, %27 : vector<8x1xi32>
    %c16_i32 = arith.constant 16 : i32
    %29 = vector.broadcast %c16_i32 : i32 to vector<8x1xi32>
    %30 = arith.cmpi slt, %26, %29 : vector<8x1xi32>
    %31 = arith.andi %28, %30 : vector<8x1xi1>
    %cst_7 = arith.constant 0.000000e+00 : f32
    %32 = vector.broadcast %cst_7 : f32 to vector<8x1xf32>
    %33 = arith.subf %32, %22 : vector<8x1xf32>
    %cst_8 = arith.constant 0.000000e+00 : f32
    %34 = vector.broadcast %cst_8 : f32 to vector<8x1xf32>
    %35 = arith.select %31, %33, %34 : vector<8x1xi1>, vector<8x1xf32>
    %36 = vector.shape_cast %35 : vector<8x1xf32> to vector<1x8x1xf32>
    %cst_9 = arith.constant dense<0.000000e+00> : vector<1xf32>
    %37 = vector.multi_reduction <add>, %36, %cst_9 [1, 2] : vector<1x8x1xf32> to vector<1xf32>
    %38 = vector.shape_cast %37 : vector<1xf32> to vector<1x1x1xf32>
    %39 = vector.extract %38[0, 0, 0] : f32 from vector<1x1x1xf32>
    %40 = tpu.iota {dimensions = array<i32: 0>} : vector<8x128xi32>
    %41 = tpu.iota {dimensions = array<i32: 1>} : vector<8x128xi32>
    %c0_i32 = arith.constant 0 : i32
    %42 = vector.broadcast %c0_i32 : i32 to vector<8x128xi32>
    %43 = arith.cmpi eq, %40, %42 : vector<8x128xi32>
    %c0_i32_10 = arith.constant 0 : i32
    %44 = vector.broadcast %c0_i32_10 : i32 to vector<8x128xi32>
    %45 = arith.cmpi eq, %41, %44 : vector<8x128xi32>
    %46 = arith.andi %43, %45 : vector<8x128xi1>
    %cst_11 = arith.constant 0.000000e+00 : f32
    %47 = vector.broadcast %39 : f32 to vector<8x128xf32>
    %48 = vector.broadcast %cst_11 : f32 to vector<8x128xf32>
    %49 = arith.select %46, %47, %48 : vector<8x128xi1>, vector<8x128xf32>
    %c0_12 = arith.constant 0 : index
    %c0_13 = arith.constant 0 : index
    %50 = vector.load %arg3[%c0_12, %c0_13] : memref<8x128xf32, #tpu.memory_space<vmem>>, vector<8x128xf32>
    tpu.vector_store %arg3[%c0_12, %c0_13], %49 {strides = array<i32>} : memref<8x128xf32, #tpu.memory_space<vmem>>, vector<8x128xf32>,
    return
  }
  func.func @transform_0(%arg0: i32) -> (i32, i32) {
    %c0_i32 = arith.constant 0 : i32
    %c0_i32_0 = arith.constant 0 : i32
    return %arg0, %c0_i32 : i32, i32
  }
  func.func @transform_1(%arg0: i32) -> (i32, i32) {
    %c0_i32 = arith.constant 0 : i32
    %c0_i32_0 = arith.constant 0 : i32
    return %arg0, %c0_i32 : i32, i32
  }
  func.func @transform_2(%arg0: i32) -> (i32, i32) {
    %c0_i32 = arith.constant 0 : i32
    %c0_i32_0 = arith.constant 0 : i32
    return %arg0, %c0_i32 : i32, i32
  }
}

</mosaic_0001>

<bundles_post_ra>
// kernel: tpu_custom_call.1
= control target key start
LH: loop header
LB: loop body
LE: loop exit
PB: predicated region body
PF: predicated region fallthrough
CT: control target
= control target key end

     0   :  { %7 = vsyncpa [#allocation3], 0  ;;  %s538_s0 = inlined_call_operand.vmem [shape: f32[16,32], index: 0, kind: input, shape index: {}]   ;;  %s539_s1 = inlined_call_operand.vmem [shape: s32[16,1], index: 1, kind: input, shape index: {}]   ;;  %s540_s2 = inlined_call_operand.hbm [shape: f32[16,128], index: 2, kind: output, shape index: {}]  }
   0x1   :  { %9 = vsyncpa [#allocation3 + $0x1], 0  ;;  %s438_s9 = smov 0   ;;  %s440_s10 = smov 0  }
   0x2   :  { %s442_s11 = smov 0   ;;  %s444_s12 = smov 0  }
   0x3 LB: > { %s459_s13 = sadd.s32 4294967295, %s419_s12   ;;  %s298_s14 = sadd.s32 4294967294, %s419_s12   ;;  %s419_s12 = sphi %s444_s12, %s546_s12   ;;  %s415_s11 = sphi %s442_s11, %s545_s11   ;;  %s411_s10 = sphi %s440_s10, %s544_s10   ;;  %s407_s9 = sphi %s438_s9, %s543_s9  }
   0x4   : > { %s463_s15 = sadd.s32 1, %s419_s12   ;;  %s74_s16 = sadd.s32 1, %s415_s11 }
   0x5   : > { %s71_s17 = ssub.s32 %s419_s12, %s463_s15  ;;  %p84_p0 = scmp.ne.s32.totalorder %s415_s11, %s411_s10 }
   0x6   : > { %p72_p1 = scmp.eq.s32.totalorder %s71_s17, 0  ;;  %p85_p2 = scmp.eq.s32.totalorder %s459_s13, 1 }
   0x7   : > { %p90_p3 = scmp.ne.s32.totalorder %s411_s10, %s407_s9  ;;  %p91_p4 = scmp.eq.s32.totalorder %s298_s14, 1 }
   0x8   : > { %s474_s18 = scalar_select %p72_p1, %s415_s11, %s74_s16  }
   0x9   : > { %p476_p5 = por %p85_p2, %p84_p0  ;;  %p480_p6 = por %p91_p4, %p90_p3 }
   0xa   : > { %p301_p7 = scmp.ge.s32.totalorder %s419_s12, 1  ;;  %p123_p8 = scmp.lt.s32.totalorder %s419_s12, 3 }
   0xc   : > { %p124_p9 = pnand %p301_p7, %p123_p8 }
   0xd   : > { %p148_p10 = scmp.lt.s32.totalorder (!%p124_p9), %s459_s13, 1  ;;  %s305_s29 = sshll.u32 (!%p124_p9), %s459_s13, 3 }
   0xe   : > { %127 = sbr.rel (%p124_p9) target bundleno = 579 (0x243), region = 28  ;;  %s145_s30 = sand.u32 (!%p124_p9), 1, %s411_s10  }
   0xf   : > { %s302_s3 = sshll.u32 (!%p124_p9), %s145_s30, 3  ;;  %s307_s4 = sshll.u32 (!%p124_p9), %s459_s13, 7 }
  0x10   : > { %s147_s5 = scalar_lea.vmem (!%p124_p9), [#allocation2], %s302_s3  ;;  %s503_s16 = scalar_lea.hbm (!%p124_p9), %s540_s2, %s307_s4 }
  0x11   : > { %s227_s6 = sshll.u32 (!%p124_p9), %s147_s5, 4  ;;  %s214_s17 = scalar_lea.sflag (!%p124_p9), [#allocation3], %s145_s30  ;;  %s228_s6 = int_to_ptr.vmem [resolvable:$true] %s227_s6 }
  0x13   : > { %v421_v0 = vmov 0   ;;  %s149_s21 = scalar_select %p148_p10, %s459_s13, 1  ;;  %vm158_vm0 = vcmask 261120   ;;  %v170_v7 = vlaneseq  ;;  %v189_v21 = vstv %s305_s29 }
  0x14   : > { %352 = vset.pattern.permute.xlu0 %v421_v0  ;;  %vm196_vm5 = vcmask 7168   ;;  %s422_s13 = smov [#allocation2]  }
  0x15   : > { %s303_s22 = sshll.u32 %s149_s21, 3  ;;  %v171_v8 = vand.u32 127, %v170_v7  ;;  %v188_v20 = vshrl.u32 %v170_v7, 7  ;;  %s359_s21 = scalar_lea.vmem %s228_s6, 128 }
  0x16   : > { %s151_s25 = scalar_lea.vmem %s538_s0, %s303_s22  ;;  %s155_s28 = scalar_lea.vmem %s539_s1, %s303_s22 }
  0x17   : > { %v156_v1 = vld [vmem:[%s151_s25] sm:$0xff]  ;;  %v190_v22 = vadd.s32 %v189_v21, %v188_v20  ;;  %vm207_vm6 = vcmp.eq.s32.totalorder %v188_v20, 0  ;;  %vm208_vm7 = vcmp.eq.s32.totalorder %v171_v8, 0  ;;  %p360_p11 = scmp.ne.s32.totalorder %s228_s6, %s359_s21  ;;  %s363_s22 = sshll.u32 %s422_s13, 4  ;;  %s364_s22 = int_to_ptr.vmem [resolvable:$false] %s363_s22 }
  0x18   : > { %v159_v2 = vsel %vm158_vm0, %v156_v1, -inf  ;;  %v157_v3 = vld [vmem:[%s155_s28] sm:$0xff]  ;;  %vm209_vm8 = vmand %vm207_vm6, %vm208_vm7  ;;  %s365_s23 = scalar_lea.vmem %s364_s22, 256  ;;  %p366_p0 = scmp.lt.s32.totalorder %s228_s6, %s364_s22 }
  0x19   : > { %160 = vmax.xlane.f32.xlu0 %v159_v2  ;;  %vm191_vm2 = vcmp.ne.s32.totalorder %v157_v3, 4294967196  ;;  %vm192_vm3 = vcmp.lt.s32.totalorder %v190_v22, 16  ;;  %p361_p12 = pnand %p360_p11, %p476_p5  ;;  %p367_p1 = scmp.lt.s32.totalorder %s365_s23, %s359_s21 }
  0x1a   : > { %vm193_vm4 = vmand %vm191_vm2, %vm192_vm3 }
  0x1b   : > { %p362_p13 = pneg %p361_p12  ;;  %p368_p2 = por %p367_p1, %p366_p0 }
  0x1d   : > { %p369_p3 = pnand %p368_p2, %p362_p13 }
  0x2f   : > { %173 = vperm.xlu0 %352, %v157_v3  }
  0xa2   : > { %v161_v4 = vpop.xlane.xlu0 %160 }
  0xa3   : > { %v162_v5 = vsub.f32 %v156_v1, %v161_v4 }
  0xa5   : > { %v163_v6 = vmul.f32 1.442695, %v162_v5 }
  0xa7   : > { %353 = vpow2.f32 %v163_v6 }
  0xaa   : > { %v174_v9 = vpop.permute.xlu0 %173 }
  0xab   : > { %vm175_vm1 = vcmp.eq.s32.totalorder %v171_v8, %v174_v9 }
  0xac   : > { %v176_v12 = vsel %vm175_vm1, %v162_v5, 0.0 }
  0xad   : > { %v177_v13 = vsel %vm158_vm0, %v176_v12, 0.0 }
  0xb4   : > { %v354_v10 = vpop.eup %353 }
  0xb5   : > { %v165_v11 = vsel %vm158_vm0, %v354_v10, 0.0 }
  0xb6   : > { %166 = vadd.xlane.f32.xlu1 %v165_v11 }
  0xba   : > { %178 = vadd.xlane.f32.xlu1 %v177_v13 }
 0x13f   : > { %v167_v14 = vpop.xlane.xlu1 %166 }
 0x140   : > { %355 = vlog2.f32 %v167_v14 }
 0x143   : > { %v179_v17 = vpop.xlane.xlu1 %178 }
 0x14d   : > { %v356_v15 = vpop.eup %355 }
 0x14e   : > { %v169_v16 = vmul.f32 0.6931472, %v356_v15 }
 0x150   : > { %v180_v18 = vsub.f32 %v179_v17, %v169_v16 }
 0x152   : > { %v181_v19 = vmul.f32 1.442695, %v180_v18 }
 0x154   : > { %357 = vpow2.f32 %v181_v19 }
 0x161   : > { %v358_v23 = vpop.eup %357 }
 0x162   : > { %v183_v24 = vsub.f32 1.0, %v358_v23 }
 0x164   : > { %v184_v25 = vmul.f32 %v183_v24, %v183_v24 }
 0x166   : > { %v185_v26 = vmul.f32 %v184_v25, %v180_v18 }
 0x168   : > { %v194_v27 = vsub.f32 0.0, %v185_v26 }
 0x16a   : > { %v195_v28 = vsel %vm193_vm4, %v194_v27, 0.0 }
 0x16b   : > { %v197_v29 = vsel %vm196_vm5, %v195_v28, 0.0 }
 0x16c   : > { %198 = vadd.xlane.f32.xlu1 %v197_v29 }
 0x1f5   : > { %v199_v30 = vpop.xlane.xlu1 %198 }
 0x1f6   : > { %v200_v31 = vrot.slane %v199_v30, 4 }
 0x1f8   : > { %v201_v32 = vadd.f32 %v200_v31, %v199_v30 }
 0x1fa   : > { %v202_v33 = vrot.slane %v201_v32, 2 }
 0x1fc   : > { %v203_v34 = vadd.f32 %v202_v33, %v201_v32 }
 0x1fe   : > { %v204_v35 = vrot.slane %v203_v34, 1 }
 0x200   : > { %v205_v36 = vadd.f32 %v204_v35, %v203_v34 }
 0x202   : > { %310 = vpush %v205_v36 }
 0x233   : > { %s311_s7 = spop %310 }
 0x234   : > { %v210_v37 = vstv %s311_s7 }
 0x235   : > { %v211_v38 = vsel %vm209_vm8, %v210_v37, 0.0 }
 0x236   : > { %212 = vst [vmem:[%s147_s5] sm:$0xff] %v211_v38 }
 0x237   : > { %372 = shalt.err (!%p369_p3)
}
 0x238   : > { %s373_s24 = scalar_lea.hbm %s503_s16, 128  ;;  %s377_s27 = scalar_lea.hbm %s540_s2, 256 }
 0x239   : > { %p374_p4 = scmp.ne.s32.totalorder %s503_s16, %s373_s24  ;;  %p378_p9 = scmp.lt.s32.totalorder %s503_s16, %s540_s2 }
 0x23a   : > { %p379_p10 = scmp.lt.s32.totalorder %s377_s27, %s373_s24 }
 0x23b   : > { %p375_p7 = pnand %p374_p4, %p476_p5 }
 0x23c   : > { %p380_p11 = por %p379_p10, %p378_p9 }
 0x23d   : > { %p376_p8 = pneg %p375_p7 }
 0x23f   : > { %p381_p12 = pnand %p380_p11, %p376_p8 }
 0x241   : > { %384 = shalt.err (!%p381_p12)
}
 0x242   : > { %312 = dma.vmem_to_hbm [thread:$0]  (%p476_p5), %s228_s6, 128, %s503_s16, %s214_s17  }
 0x243 PF: > { %p318_p13 = scmp.ge.s32.totalorder %s419_s12, 2  ;;  %s239_s30 = sand.u32 1, %s407_s9  }
 0x244   : > { %s240_s3 = scalar_lea.sflag [#allocation3], %s239_s30 }
 0x245   : > { %p315_p0 = pnand %p318_p13, %p480_p6 }
 0x247   : > { %p316_p1 = pneg %p315_p0 }
 0x249   : > { %402 = dma.done.wait (%p316_p1), %s240_s3, 128  }
 0x24a   : > { %404 = vsyncadd (%p316_p1), %s240_s3, 4294967168  ;;  %p12_p2 = scmp.ge.s32.totalorder %s463_s15, 4   ;;  %s543_s9 = smov %s411_s10 }
 0x24b   : > { %s544_s10 = smov %s415_s11  ;;  %s545_s11 = smov %s474_s18 }
 0x24c   : > { %s546_s12 = smov %s463_s15  ;;  %14 = sbr.rel (!%p12_p2) target bundleno = 3 (0x3), region = 66 }
 0x251   :  { %245 = vsyncpa [#allocation3], 1 }
 0x252   :  { %247 = vsyncpa [#allocation3 + $0x1], 1 }

</bundles_post_ra>
